<compile_context>
chip_gen: v5e
topology: v5e:2x2
jax: 0.10.0
libtpu: 0.0.40
codegen_flags: <defaults>
</compile_context>

<pallas_src>
import functools

import jax
import jax.numpy as jnp
from jax import lax
from jax.experimental import pallas as pl
from jax.experimental.pallas import tpu as pltpu

LANE = 128
SUBLANE = 8
CHUNK_ROWS = 512  # rows per inner fori_loop step (256 KiB f32 live data)


def _round_up(x, m):
    return ((x + m - 1) // m) * m


def _tpu_defaults():
    """Generation-aware (tile_rows, parts, vmem_limit_bytes)."""
    kind = ""
    try:
        kind = jax.devices()[0].device_kind.lower()
    except Exception:
        pass
    if "v7" in kind:
        # 2 TensorCores/chip, ~3.2 TB/s HBM, 64 MiB VMEM/TC.
        return 8192, 2, 48 * 1024 * 1024
    if "v6" in kind:
        # Single TC; 2 inputs x 2 buffers x 4 MiB = 16 MiB fits the 32 MiB default.
        return 8192, 1, None
    # v5e / unknown: conservative (16 MiB scoped-VMEM default).
    return 4096, 1, None


def _expectile_kernel(pred_ref, targ_ref, out_ref, acc_ref, *,
                      w_neg, w_pos, inv_n, tile_rows, chunk_rows,
                      rows_valid, total_tiles, steps, needs_mask):
    p = pl.program_id(0)
    s = pl.program_id(1)

    @pl.when(s == 0)
    def _():
        acc_ref[...] = jnp.zeros_like(acc_ref)

    tile_idx = p * steps + s
    num_chunks = tile_rows // chunk_rows
    groups = chunk_rows // SUBLANE

    # Hoisted once; JAX does not CSE broadcast_in_dim inside the loop.
    chunk_iota = (lax.broadcasted_iota(jnp.int32, (chunk_rows, 1), 0)
                  if needs_mask else None)

    def _accumulate(masked):
        row0_of_tile = tile_idx * tile_rows

        def body(c, carry):
            r0 = pl.multiple_of(c * chunk_rows, chunk_rows)
            res = (pred_ref[pl.ds(r0, chunk_rows), :].astype(jnp.float32)
                   - targ_ref[pl.ds(r0, chunk_rows), :].astype(jnp.float32))
            # |tau - (res < 0)| == |tau - 1| where res < 0, |tau| otherwise.
            weight = jnp.where(res < 0, jnp.float32(w_neg), jnp.float32(w_pos))
            contrib = weight * (res * res)
            if masked:
                # Zero out rows past the valid data (partial trailing tile:
                # the un-DMA'd VMEM region holds garbage).  where() is a
                # select, so garbage/NaN never reaches the accumulator.
                row_ids = row0_of_tile + r0 + chunk_iota
                contrib = jnp.where(row_ids < rows_valid, contrib,
                                    jnp.float32(0.0))
            # vreg-shaped accumulator: VALU-only fold to (8, 128).
            acc_ref[...] += contrib.reshape(groups, SUBLANE, LANE).sum(axis=0)
            return carry

        lax.fori_loop(0, num_chunks, body, 0)

    @pl.when(tile_idx < total_tiles)
    def _():
        if needs_mask:
            @pl.when(tile_idx < total_tiles - 1)
            def _():
                _accumulate(masked=False)

            @pl.when(tile_idx == total_tiles - 1)
            def _():
                _accumulate(masked=True)
        else:
            _accumulate(masked=False)

    @pl.when(s == pl.num_programs(1) - 1)
    def _():
        # Fold 1/N in-kernel; only a tiny sum of the partials remains outside.
        out_ref[0] = acc_ref[...] * jnp.float32(inv_n)


def expectile_loss(predictions, targets, tau=0.7,
                   row_tile=None, num_parts=None, vmem_limit_bytes=None):
    assert predictions.shape == targets.shape
    n_elems = predictions.size
    assert n_elems > 0

    d_tile, d_parts, d_vmem = _tpu_defaults()
    row_tile = d_tile if row_tile is None else int(row_tile)
    num_parts = d_parts if num_parts is None else int(num_parts)
    vmem_limit_bytes = d_vmem if vmem_limit_bytes is None else vmem_limit_bytes
    row_tile = _round_up(max(row_tile, SUBLANE), SUBLANE)

    flat_p = predictions.reshape(-1)
    flat_t = targets.reshape(-1)

    rows = pl.cdiv(n_elems, LANE)  # valid data rows (last one may be partial)

    # Tile rows: multiple of the chunk size (and of 8) so the inner loop and
    # the (8,128) block constraint both divide evenly.
    tile_rows = min(row_tile, _round_up(rows, SUBLANE))
    chunk_rows = min(CHUNK_ROWS, tile_rows)
    tile_rows = _round_up(tile_rows, chunk_rows)

    # Pad ONLY what the (rows, 128) reshape / single-tile case requires:
    #   * up to a lane multiple when n_elems % 128 != 0 (needed for reshape);
    #   * up to one tile when the whole input is smaller than a tile (tiny).
    # Large lane-aligned inputs take the zero-copy path; the ragged trailing
    # tile is handled by partial-block DMA + the in-kernel row mask.
    # Identical zero padding on both operands -> zero residual -> no bias.
    rows2d = max(rows, tile_rows)
    pad = rows2d * LANE - n_elems
    if pad:
        flat_p = jnp.pad(flat_p, (0, pad))
        flat_t = jnp.pad(flat_t, (0, pad))

    pred2d = flat_p.reshape(rows2d, LANE)
    targ2d = flat_t.reshape(rows2d, LANE)

    total_tiles = pl.cdiv(rows2d, tile_rows)
    parts = num_parts if total_tiles >= num_parts else 1
    steps = pl.cdiv(total_tiles, parts)

    # Mask only needed when the last tile extends past the stored rows.
    needs_mask = rows2d < total_tiles * tile_rows

    tau_f = float(tau)
    kernel = functools.partial(
        _expectile_kernel,
        w_neg=abs(tau_f - 1.0), w_pos=abs(tau_f),
        inv_n=1.0 / float(n_elems),
        tile_rows=tile_rows, chunk_rows=chunk_rows,
        rows_valid=rows, total_tiles=total_tiles, steps=steps,
        needs_mask=bool(needs_mask))

    def tile_map(p, s):
        # Clamp so the parts split never forces padding; out-of-range steps
        # revisit the last tile (no extra DMA) and skip accumulation.
        return (jnp.minimum(p * steps + s, total_tiles - 1), 0)

    partials = pl.pallas_call(
        kernel,
        out_shape=jax.ShapeDtypeStruct((parts, SUBLANE, LANE), jnp.float32),
        grid_spec=pltpu.PrefetchScalarGridSpec(
            num_scalar_prefetch=0,
            grid=(parts, steps),
            in_specs=[
                pl.BlockSpec((tile_rows, LANE), tile_map),
                pl.BlockSpec((tile_rows, LANE), tile_map),
            ],
            out_specs=pl.BlockSpec((1, SUBLANE, LANE), lambda p, s: (p, 0, 0)),
            scratch_shapes=[pltpu.VMEM((SUBLANE, LANE), jnp.float32)],
        ),
        compiler_params=pltpu.CompilerParams(
            dimension_semantics=("parallel", "arbitrary"),
            vmem_limit_bytes=vmem_limit_bytes,
        ),
    )(pred2d, targ2d)

    # 1/N already folded in-kernel; only a tiny partial-sum remains.
    return jnp.sum(partials)


def expectile_loss_ref(predictions, targets, tau=0.7):
    res = predictions.astype(jnp.float32) - targets.astype(jnp.float32)
    w = jnp.abs(jnp.float32(tau) - (res < 0).astype(jnp.float32))
    return jnp.mean(w * res * res)


if __name__ == "__main__":
    key = jax.random.PRNGKey(0)
    keys = jax.random.split(key, 10)

    # 1) Small aligned value-regression-style inputs (zero-copy path).
    p1 = jax.random.normal(keys[0], (16, 128), dtype=jnp.float32)
    t1 = jax.random.normal(keys[1], (16, 128), dtype=jnp.float32)
    l1 = expectile_loss(p1, t1, tau=0.7)
    jax.block_until_ready(l1)
    r1 = expectile_loss_ref(p1, t1, tau=0.7)
    assert jnp.allclose(l1, r1, rtol=1e-4, atol=1e-6), (l1, r1)

    # 2) Non-lane-aligned shape (exercises the tail zero-padding path).
    p2 = jax.random.normal(keys[2], (5, 37), dtype=jnp.float32)
    t2 = jax.random.normal(keys[3], (5, 37), dtype=jnp.float32)
    l2 = expectile_loss(p2, t2, tau=0.7)
    jax.block_until_ready(l2)
    r2 = expectile_loss_ref(p2, t2, tau=0.7)
    assert jnp.allclose(l2, r2, rtol=1e-4, atol=1e-6), (l2, r2)

    # 3) tau outside [0, 1] (exercises the |tau-1| / |tau| constant folding).
    p3 = jax.random.normal(keys[4], (3, 257), dtype=jnp.float32)
    t3 = jax.random.normal(keys[5], (3, 257), dtype=jnp.float32)
    l3 = expectile_loss(p3, t3, tau=1.3)
    jax.block_until_ready(l3)
    r3 = expectile_loss_ref(p3, t3, tau=1.3)
    assert jnp.allclose(l3, r3, rtol=1e-4, atol=1e-6), (l3, r3)

    # 4) Multi-tile + parts split + ragged trailing tile (clamped index_map,
    #    pl.when skip, in-kernel row mask) with small forced tiles.
    p4 = jax.random.normal(keys[6], (1000, 33), dtype=jnp.float32)
    t4 = jax.random.normal(keys[7], (1000, 33), dtype=jnp.float32)
    l4 = expectile_loss(p4, t4, tau=0.7, row_tile=64, num_parts=2)
    jax.block_until_ready(l4)
    r4 = expectile_loss_ref(p4, t4, tau=0.7)
    assert jnp.allclose(l4, r4, rtol=1e-4, atol=1e-6), (l4, r4)

    # 5) bf16 inputs streamed as bf16, upcast to f32 in-kernel.
    p5 = jax.random.normal(keys[8], (64, 160), dtype=jnp.float32).astype(jnp.bfloat16)
    t5 = jax.random.normal(keys[9], (64, 160), dtype=jnp.float32).astype(jnp.bfloat16)
    l5 = expectile_loss(p5, t5, tau=0.7)
    jax.block_until_ready(l5)
    r5 = expectile_loss_ref(p5, t5, tau=0.7)
    assert jnp.allclose(l5, r5, rtol=1e-4, atol=1e-6), (l5, r5)

    print("KERNEL_OK")
</pallas_src>

<mosaic_0001>
module attributes {stable_mosaic.version = 11 : i64} {
  func.func @_expectile_kernel(%arg0: i32, %arg1: i32, %arg2: memref<16x128xf32, #tpu.memory_space<vmem>>, %arg3: memref<16x128xf32, #tpu.memory_space<vmem>>, %arg4: memref<1x8x128xf32, #tpu.memory_space<vmem>>, %arg5: memref<8x128xf32, #tpu.memory_space<vmem>>) attributes {dimension_semantics = [#tpu.dimension_semantics<parallel>, #tpu.dimension_semantics<arbitrary>], iteration_bounds = array<i64: 1, 1>, scalar_prefetch = 0 : i64, scratch_operands = 1 : i64, tpu.core_type = #tpu.core_type<tc>, window_params = [{transform_indices = @transform_0, window_bounds = array<i64: 16, 128>}, {transform_indices = @transform_1, window_bounds = array<i64: 16, 128>}, {transform_indices = @transform_2, window_bounds = array<i64: 1, 8, 128>}]} {
    %c0_i32 = arith.constant 0 : i32
    %0 = arith.cmpi eq, %arg1, %c0_i32 : i32
    %1 = arith.extui %0 : i1 to i32
    %c0_i32_0 = arith.constant 0 : i32
    %2 = arith.cmpi ne, %1, %c0_i32_0 : i32
    scf.if %2 {
      %cst = arith.constant 0.000000e+00 : f32
      %11 = vector.broadcast %cst : f32 to vector<8x128xf32>
      %c0 = arith.constant 0 : index
      %c0_5 = arith.constant 0 : index
      %12 = vector.load %arg5[%c0, %c0_5] : memref<8x128xf32, #tpu.memory_space<vmem>>, vector<8x128xf32>
      tpu.vector_store %arg5[%c0, %c0_5], %11 {strides = array<i32>} : memref<8x128xf32, #tpu.memory_space<vmem>>, vector<8x128xf32>,
    } else {
    }
    %c1_i32 = arith.constant 1 : i32
    %3 = arith.muli %arg0, %c1_i32 : i32
    %4 = arith.addi %3, %arg1 : i32
    %c1_i32_1 = arith.constant 1 : i32
    %5 = arith.cmpi slt, %4, %c1_i32_1 : i32
    %6 = arith.extui %5 : i1 to i32
    %c0_i32_2 = arith.constant 0 : i32
    %7 = arith.cmpi ne, %6, %c0_i32_2 : i32
    scf.if %7 {
      %c0_i32_5 = arith.constant 0 : i32
      %c16_i32 = arith.constant 16 : i32
      %11 = arith.muli %c0_i32_5, %c16_i32 : i32
      %12 = tpu.assume_multiple %11, 16 : i32
      %13 = arith.index_cast %12 : i32 to index
      %c0 = arith.constant 0 : index
      %14 = vector.load %arg2[%13, %c0] : memref<16x128xf32, #tpu.memory_space<vmem>>, vector<16x128xf32>
      %15 = arith.index_cast %12 : i32 to index
      %c0_6 = arith.constant 0 : index
      %16 = vector.load %arg3[%15, %c0_6] : memref<16x128xf32, #tpu.memory_space<vmem>>, vector<16x128xf32>
      %17 = arith.subf %14, %16 : vector<16x128xf32>
      %cst = arith.constant 0.000000e+00 : f32
      %18 = vector.broadcast %cst : f32 to vector<16x128xf32>
      %19 = arith.cmpf olt, %17, %18 : vector<16x128xf32>
      %cst_7 = arith.constant 3.000000e-01 : f32
      %cst_8 = arith.constant 0.699999988 : f32
      %20 = vector.broadcast %cst_7 : f32 to vector<16x128xf32>
      %21 = vector.broadcast %cst_8 : f32 to vector<16x128xf32>
      %22 = arith.select %19, %20, %21 : vector<16x128xi1>, vector<16x128xf32>
      %23 = arith.mulf %17, %17 : vector<16x128xf32>
      %24 = arith.mulf %22, %23 : vector<16x128xf32>
      %c0_9 = arith.constant 0 : index
      %c0_10 = arith.constant 0 : index
      %25 = vector.load %arg5[%c0_9, %c0_10] : memref<8x128xf32, #tpu.memory_space<vmem>>, vector<8x128xf32>
      %26 = vector.shape_cast %24 : vector<16x128xf32> to vector<2x8x128xf32>
      %cst_11 = arith.constant dense<0.000000e+00> : vector<8x128xf32>
      %27 = vector.multi_reduction <add>, %26, %cst_11 [0] : vector<2x8x128xf32> to vector<8x128xf32>
      %28 = arith.addf %25, %27 : vector<8x128xf32>
      %c0_12 = arith.constant 0 : index
      %c0_13 = arith.constant 0 : index
      %29 = vector.load %arg5[%c0_12, %c0_13] : memref<8x128xf32, #tpu.memory_space<vmem>>, vector<8x128xf32>
      tpu.vector_store %arg5[%c0_12, %c0_13], %28 {strides = array<i32>} : memref<8x128xf32, #tpu.memory_space<vmem>>, vector<8x128xf32>,
      %c1_i32_14 = arith.constant 1 : i32
    } else {
    }
    %c0_i32_3 = arith.constant 0 : i32
    %8 = arith.cmpi eq, %arg1, %c0_i32_3 : i32
    %9 = arith.extui %8 : i1 to i32
    %c0_i32_4 = arith.constant 0 : i32
    %10 = arith.cmpi ne, %9, %c0_i32_4 : i32
    scf.if %10 {
      %c0 = arith.constant 0 : index
      %c0_5 = arith.constant 0 : index
      %11 = vector.load %arg5[%c0, %c0_5] : memref<8x128xf32, #tpu.memory_space<vmem>>, vector<8x128xf32>
      %cst = arith.constant 4.8828125E-4 : f32
      %12 = vector.broadcast %cst : f32 to vector<8x128xf32>
      %13 = arith.mulf %11, %12 : vector<8x128xf32>
      %c0_6 = arith.constant 0 : index
      %c0_7 = arith.constant 0 : index
      %c0_8 = arith.constant 0 : index
      %14 = vector.load %arg4[%c0_6, %c0_7, %c0_8] : memref<1x8x128xf32, #tpu.memory_space<vmem>>, vector<1x8x128xf32>
      %15 = vector.shape_cast %14 : vector<1x8x128xf32> to vector<8x128xf32>
      %16 = vector.shape_cast %13 : vector<8x128xf32> to vector<1x8x128xf32>
      tpu.vector_store %arg4[%c0_6, %c0_7, %c0_8], %16 {strides = array<i32>} : memref<1x8x128xf32, #tpu.memory_space<vmem>>, vector<1x8x128xf32>,
    } else {
    }
    return
  }
  func.func @transform_0(%arg0: i32, %arg1: i32) -> (i32, i32) {
    %c1_i32 = arith.constant 1 : i32
    %0 = arith.muli %arg0, %c1_i32 : i32
    %1 = arith.addi %0, %arg1 : i32
    %c0_i32 = arith.constant 0 : i32
    %2 = arith.minsi %1, %c0_i32 : i32
    %c0_i32_0 = arith.constant 0 : i32
    %c0_i32_1 = arith.constant 0 : i32
    return %2, %c0_i32_0 : i32, i32
  }
  func.func @transform_1(%arg0: i32, %arg1: i32) -> (i32, i32) {
    %c1_i32 = arith.constant 1 : i32
    %0 = arith.muli %arg0, %c1_i32 : i32
    %1 = arith.addi %0, %arg1 : i32
    %c0_i32 = arith.constant 0 : i32
    %2 = arith.minsi %1, %c0_i32 : i32
    %c0_i32_0 = arith.constant 0 : i32
    %c0_i32_1 = arith.constant 0 : i32
    return %2, %c0_i32_0 : i32, i32
  }
  func.func @transform_2(%arg0: i32, %arg1: i32) -> (i32, i32, i32) {
    %c0_i32 = arith.constant 0 : i32
    %c0_i32_0 = arith.constant 0 : i32
    %c0_i32_1 = arith.constant 0 : i32
    return %arg0, %c0_i32, %c0_i32_0 : i32, i32, i32
  }
}

</mosaic_0001>

<bundles_post_ra>
// kernel: tpu_custom_call.1
= control target key start
LH: loop header
LB: loop body
LE: loop exit
PB: predicated region body
PF: predicated region fallthrough
CT: control target
= control target key end

     0   :  { %7 = vsyncpa [#allocation4], 0  ;;  %s234_s0 = inlined_call_operand.hbm [shape: f32[16,128], index: 0, kind: input, shape index: {}]   ;;  %s235_s1 = inlined_call_operand.hbm [shape: f32[16,128], index: 1, kind: input, shape index: {}]   ;;  %s236_s2 = inlined_call_operand.hbm [shape: f32[1,8,128], index: 2, kind: output, shape index: {}]  }
   0x1   :  { %8 = vsyncpa [#allocation7], 0 }
   0x2   :  { %9 = vsyncpa [#allocation5], 0  ;;  %s20_s11 = sshll.u32 %s234_s0, 4  ;;  %s204_s12 = smov [#allocation3]   ;;  %s21_s11 = int_to_ptr.hbm [resolvable:$true] %s20_s11 }
   0x3   :  { %s22_s13 = sshll.u32 %s204_s12, 4  ;;  %s39_s16 = sshll.u32 %s235_s1, 4  ;;  %s23_s13 = int_to_ptr.vmem [resolvable:$true] %s22_s13  ;;  %s40_s16 = int_to_ptr.hbm [resolvable:$true] %s39_s16 }
   0x4   :  { %s205_s17 = smov 128   ;;  %s206_s18 = smov 8  }
   0x5   :  { %28 = dma.hbm_to_vmem [thread:$0]  %s21_s11, 256, %s23_s13, [#allocation4], %s205_s17, %s205_s17, %s206_s18  }
   0x6   :  { %s207_s19 = smov [#allocation6]  }
   0x7   :  { %s41_s20 = sshll.u32 %s207_s19, 4  ;;  %s42_s20 = int_to_ptr.vmem [resolvable:$true] %s41_s20 }
   0x8   :  { %47 = dma.hbm_to_vmem [thread:$0]  %s40_s16, 256, %s42_s20, [#allocation7], %s205_s17, %s205_s17, %s206_s18  }
   0x9   :  { %198 = dma.done.wait [#allocation4], 256  }
   0xa   :  { %199 = vsyncadd [#allocation4], 4294967040 }
   0xb   :  { %200 = dma.done.wait [#allocation7], 256  }
   0xc   :  { %201 = vsyncadd [#allocation7], 4294967040  ;;  %v74_v0 = vld [vmem:[#allocation3] sm:$0xff]  ;;  %v75_v1 = vld [vmem:[#allocation3 + $0x8] sm:$0xff]  ;;  %v208_v7 = vmov 0.7  }
   0xd   :  { %v76_v2 = vld [vmem:[#allocation6] sm:$0xff]  ;;  %v77_v3 = vld [vmem:[#allocation6 + $0x8] sm:$0xff]  ;;  %s209_s0 = smov [#allocation8]   ;;  %s105_s23 = sshll.u32 %s236_s2, 4  ;;  %s106_s23 = int_to_ptr.hbm [resolvable:$true] %s105_s23 }
   0xe   :  { %v78_v4 = vsub.f32 %v74_v0, %v76_v2  ;;  %v79_v5 = vsub.f32 %v75_v1, %v77_v3  ;;  %s103_s1 = sshll.u32 %s209_s0, 4  ;;  %s104_s1 = int_to_ptr.vmem [resolvable:$true] %s103_s1 }
  0x10   :  { %vm80_vm0 = vcmp.lt.f32.partialorder %v78_v4, 0.0  ;;  %v84_v6 = vmul.f32 %v78_v4, %v78_v4  ;;  %vm81_vm1 = vcmp.lt.f32.partialorder %v79_v5, 0.0  ;;  %v85_v9 = vmul.f32 %v79_v5, %v79_v5 }
  0x11   :  { %v82_v8 = vsel %vm80_vm0, 0.3, %v208_v7  ;;  %v83_v10 = vsel %vm81_vm1, 0.3, %v208_v7 }
  0x12   :  { %v86_v11 = vmul.f32 %v84_v6, %v82_v8  ;;  %v87_v12 = vmul.f32 %v85_v9, %v83_v10 }
  0x14   :  { %v89_v13 = vadd.f32 %v87_v12, %v86_v11 }
  0x16   :  { %v96_v14 = vmul.f32 0.00048828125, %v89_v13 }
  0x18   :  { %97 = vst [vmem:[#allocation8] sm:$0xff] %v96_v14 }
  0x19   :  { %108 = dma.vmem_to_hbm [thread:$0]  %s104_s1, 128, %s106_s23, [#allocation5]  }
  0x1a   :  { %202 = dma.done.wait [#allocation5], 128  }
  0x1b   :  { %203 = vsyncadd [#allocation5], 4294967168 }
  0x1c   :  { %113 = vsyncpa [#allocation4], 1 }
  0x1d   :  { %114 = vsyncpa [#allocation7], 1 }
  0x1e   :  { %115 = vsyncpa [#allocation5], 1 }

</bundles_post_ra>
